<compile_context>
chip_gen: v7x
topology: tpu7x:2x2x1
jax: 0.10.0
libtpu: 0.0.40
codegen_flags: <defaults>
</compile_context>

<pallas_src>
import jax
import jax.numpy as jnp
from jax.experimental import pallas as pl
from jax.experimental.pallas import tpu as pltpu


def _decoder_kernel(x_ref, w1_ref, b1_ref, w2_ref, b2_ref, w3_ref, b3_ref, o_ref):
    # Layer 1: (tb, S) @ (S, H) on the MXU, f32 accumulation; bias + ReLU in f32.
    h1 = jnp.dot(x_ref[...], w1_ref[...], preferred_element_type=jnp.float32)
    h1 = jnp.maximum(h1 + b1_ref[...], 0.0)
    # Layer 2: cast activations to the weight dtype (bf16) for the native MXU path.
    h2 = jnp.dot(h1.astype(w2_ref.dtype), w2_ref[...],
                 preferred_element_type=jnp.float32)
    h2 = jnp.maximum(h2 + b2_ref[...], 0.0)
    # Layer 3: no activation.
    out = jnp.dot(h2.astype(w3_ref.dtype), w3_ref[...],
                  preferred_element_type=jnp.float32)
    o_ref[...] = (out + b3_ref[...]).astype(o_ref.dtype)


def _round_up(x, m):
    return ((x + m - 1) // m) * m


def decoder_forward(state, w1, b1, w2, b2, w3, b3, *,
                    max_tile_b=4096, min_steps=2, compute_dtype=jnp.bfloat16):
    """Fused 3-layer MLP forward, tiled over the batch dimension only.

    state: (B, S) f32; w_i: (in, out); b_i: (1, out). Returns (B, O) f32.
    """
    B, S = state.shape
    H = w1.shape[1]
    O = w3.shape[1]

    # Batch tile: aim for >= min_steps grid steps (so the "parallel" batch axis
    # splits across both v7x TensorCores), multiple of 8 (sublane), capped at
    # max_tile_b. No padding of B: the ragged last tile is masked by Pallas.
    tb = _round_up(pl.cdiv(B, min_steps), 8)
    tb = min(tb, max_tile_b)
    tb = min(tb, _round_up(B, 8))
    grid = (pl.cdiv(B, tb),)

    # bf16 inputs/weights (f32 accumulation in-kernel); biases stay f32.
    x = state.astype(compute_dtype)
    w1c, w2c, w3c = (w.astype(compute_dtype) for w in (w1, w2, w3))
    b1c, b2c, b3c = (b.astype(jnp.float32) for b in (b1, b2, b3))

    const = lambda i: (0, 0)  # weights/biases: same (full-array) block every step
    return pl.pallas_call(
        _decoder_kernel,
        out_shape=jax.ShapeDtypeStruct((B, O), jnp.float32),
        grid=grid,
        in_specs=[
            pl.BlockSpec((tb, S), lambda i: (i, 0)),   # x tile marches over batch
            pl.BlockSpec((S, H), const), pl.BlockSpec((1, H), const),
            pl.BlockSpec((H, H), const), pl.BlockSpec((1, H), const),
            pl.BlockSpec((H, O), const), pl.BlockSpec((1, O), const),
        ],
        out_specs=pl.BlockSpec((tb, O), lambda i: (i, 0)),
        compiler_params=pltpu.CompilerParams(
            dimension_semantics=("parallel",)),
    )(x, w1c, b1c, w2c, b2c, w3c, b3c)


def init_decoder_params(key, state_dim, observation_dim, hidden_dim=None):
    """Deterministic init mimicking nn.Linear default (uniform +-1/sqrt(fan_in))."""
    hidden_dim = hidden_dim if hidden_dim is not None else 2 * state_dim
    dims = [(state_dim, hidden_dim), (hidden_dim, hidden_dim),
            (hidden_dim, observation_dim)]
    params = []
    for (fan_in, fan_out) in dims:
        key, kw, kb = jax.random.split(key, 3)
        bound = 1.0 / jnp.sqrt(float(fan_in))
        w = jax.random.uniform(kw, (fan_in, fan_out), jnp.float32, -bound, bound)
        b = jax.random.uniform(kb, (1, fan_out), jnp.float32, -bound, bound)
        params += [w, b]
    return params


def reference_forward(state, w1, b1, w2, b2, w3, b3):
    h1 = jnp.maximum(state @ w1 + b1, 0.0)
    h2 = jnp.maximum(h1 @ w2 + b2, 0.0)
    return h2 @ w3 + b3


if __name__ == "__main__":
    key = jax.random.PRNGKey(0)
    state_dim = 32
    observation_dim = 16
    hidden_dim = 2 * state_dim  # default from module __init__

    k_x, k_p, k_x2 = jax.random.split(key, 3)
    params = init_decoder_params(k_p, state_dim, observation_dim, hidden_dim)

    # Tolerances are relaxed to ~2e-2 because inputs/weights are bf16 in the
    # kernel (f32 accumulation), per the perf review.
    ATOL = RTOL = 2e-2

    # Small batch (module's typical per-step usage; kernel run here only to
    # exercise the single-tile path — production tiny-batch callers should
    # batch timesteps or use plain XLA, see NOTE above).
    batch = 8
    state = jax.random.normal(k_x, (batch, state_dim), jnp.float32)
    out = jax.block_until_ready(decoder_forward(state, *params))
    ref = reference_forward(state, *params)
    assert out.shape == (batch, observation_dim)
    assert jnp.allclose(out, ref, atol=ATOL, rtol=RTOL), "mismatch vs reference (B=8)"

    # Larger batch to exercise the multi-step batch grid (2 tiles, ragged last
    # tile masked on store).
    big_batch = 1000
    state_big = jax.random.normal(k_x2, (big_batch, state_dim), jnp.float32)
    out_big = jax.block_until_ready(decoder_forward(state_big, *params))
    ref_big = reference_forward(state_big, *params)
    assert out_big.shape == (big_batch, observation_dim)
    assert jnp.allclose(out_big, ref_big, atol=ATOL, rtol=RTOL), \
        "mismatch vs reference (B=1000)"

    print("KERNEL_OK")
</pallas_src>

<mosaic_0001>
module attributes {stable_mosaic.version = 11 : i64} {
  func.func @_decoder_kernel(%arg0: i32, %arg1: memref<8x32xbf16, #tpu.memory_space<vmem>>, %arg2: memref<32x64xbf16, #tpu.memory_space<vmem>>, %arg3: memref<1x64xf32, #tpu.memory_space<vmem>>, %arg4: memref<64x64xbf16, #tpu.memory_space<vmem>>, %arg5: memref<1x64xf32, #tpu.memory_space<vmem>>, %arg6: memref<64x16xbf16, #tpu.memory_space<vmem>>, %arg7: memref<1x16xf32, #tpu.memory_space<vmem>>, %arg8: memref<8x16xf32, #tpu.memory_space<vmem>>) attributes {dimension_semantics = [#tpu.dimension_semantics<parallel>], iteration_bounds = array<i64: 1>, scalar_prefetch = 0 : i64, scratch_operands = 0 : i64, tpu.core_type = #tpu.core_type<tc>, window_params = [{transform_indices = @transform_0, window_bounds = array<i64: 8, 32>}, {pipeline_mode = #tpu.pipeline_mode<synchronous>, transform_indices = @transform_1, window_bounds = array<i64: 32, 64>}, {pipeline_mode = #tpu.pipeline_mode<synchronous>, transform_indices = @transform_2, window_bounds = array<i64: 1, 64>}, {pipeline_mode = #tpu.pipeline_mode<synchronous>, transform_indices = @transform_3, window_bounds = array<i64: 64, 64>}, {pipeline_mode = #tpu.pipeline_mode<synchronous>, transform_indices = @transform_4, window_bounds = array<i64: 1, 64>}, {pipeline_mode = #tpu.pipeline_mode<synchronous>, transform_indices = @transform_5, window_bounds = array<i64: 64, 16>}, {pipeline_mode = #tpu.pipeline_mode<synchronous>, transform_indices = @transform_6, window_bounds = array<i64: 1, 16>}, {transform_indices = @transform_7, window_bounds = array<i64: 8, 16>}]} {
    %c0 = arith.constant 0 : index
    %c0_0 = arith.constant 0 : index
    %0 = vector.load %arg1[%c0, %c0_0] : memref<8x32xbf16, #tpu.memory_space<vmem>>, vector<8x32xbf16>
    %c0_1 = arith.constant 0 : index
    %c0_2 = arith.constant 0 : index
    %1 = vector.load %arg2[%c0_1, %c0_2] : memref<32x64xbf16, #tpu.memory_space<vmem>>, vector<32x64xbf16>
    %cst = arith.constant dense<0.000000e+00> : vector<8x64xf32>
    %2 = tpu.matmul %0, %1, %cst {dimension_numbers = #tpu.dot_dimension_numbers<[1], [0], [0], [1], [0, 0, 1, 1], [], []>} : vector<8x32xbf16>, vector<32x64xbf16>, vector<8x64xf32> -> vector<8x64xf32>
    %c0_3 = arith.constant 0 : index
    %c0_4 = arith.constant 0 : index
    %3 = vector.load %arg3[%c0_3, %c0_4] : memref<1x64xf32, #tpu.memory_space<vmem>>, vector<1x64xf32>
    %4 = vector.broadcast %3 : vector<1x64xf32> to vector<8x64xf32>
    %5 = arith.addf %2, %4 : vector<8x64xf32>
    %cst_5 = arith.constant 0.000000e+00 : f32
    %6 = vector.broadcast %cst_5 : f32 to vector<8x64xf32>
    %7 = arith.maximumf %5, %6 : vector<8x64xf32>
    %8 = arith.truncf %7 : vector<8x64xf32> to vector<8x64xbf16>
    %c0_6 = arith.constant 0 : index
    %c0_7 = arith.constant 0 : index
    %9 = vector.load %arg4[%c0_6, %c0_7] : memref<64x64xbf16, #tpu.memory_space<vmem>>, vector<64x64xbf16>
    %cst_8 = arith.constant dense<0.000000e+00> : vector<8x64xf32>
    %10 = tpu.matmul %8, %9, %cst_8 {dimension_numbers = #tpu.dot_dimension_numbers<[1], [0], [0], [1], [0, 0, 1, 1], [], []>} : vector<8x64xbf16>, vector<64x64xbf16>, vector<8x64xf32> -> vector<8x64xf32>
    %c0_9 = arith.constant 0 : index
    %c0_10 = arith.constant 0 : index
    %11 = vector.load %arg5[%c0_9, %c0_10] : memref<1x64xf32, #tpu.memory_space<vmem>>, vector<1x64xf32>
    %12 = vector.broadcast %11 : vector<1x64xf32> to vector<8x64xf32>
    %13 = arith.addf %10, %12 : vector<8x64xf32>
    %cst_11 = arith.constant 0.000000e+00 : f32
    %14 = vector.broadcast %cst_11 : f32 to vector<8x64xf32>
    %15 = arith.maximumf %13, %14 : vector<8x64xf32>
    %16 = arith.truncf %15 : vector<8x64xf32> to vector<8x64xbf16>
    %c0_12 = arith.constant 0 : index
    %c0_13 = arith.constant 0 : index
    %17 = vector.load %arg6[%c0_12, %c0_13] : memref<64x16xbf16, #tpu.memory_space<vmem>>, vector<64x16xbf16>
    %cst_14 = arith.constant dense<0.000000e+00> : vector<8x16xf32>
    %18 = tpu.matmul %16, %17, %cst_14 {dimension_numbers = #tpu.dot_dimension_numbers<[1], [0], [0], [1], [0, 0, 1, 1], [], []>} : vector<8x64xbf16>, vector<64x16xbf16>, vector<8x16xf32> -> vector<8x16xf32>
    %c0_15 = arith.constant 0 : index
    %c0_16 = arith.constant 0 : index
    %19 = vector.load %arg7[%c0_15, %c0_16] : memref<1x16xf32, #tpu.memory_space<vmem>>, vector<1x16xf32>
    %20 = vector.broadcast %19 : vector<1x16xf32> to vector<8x16xf32>
    %21 = arith.addf %18, %20 : vector<8x16xf32>
    %c0_17 = arith.constant 0 : index
    %c0_18 = arith.constant 0 : index
    %22 = vector.load %arg8[%c0_17, %c0_18] : memref<8x16xf32, #tpu.memory_space<vmem>>, vector<8x16xf32>
    tpu.vector_store %arg8[%c0_17, %c0_18], %21 {strides = array<i32>} : memref<8x16xf32, #tpu.memory_space<vmem>>, vector<8x16xf32>,
    return
  }
  func.func @transform_0(%arg0: i32) -> (i32, i32) {
    %c0_i32 = arith.constant 0 : i32
    %c0_i32_0 = arith.constant 0 : i32
    return %arg0, %c0_i32 : i32, i32
  }
  func.func @transform_1(%arg0: i32) -> (i32, i32) {
    %c0_i32 = arith.constant 0 : i32
    %c0_i32_0 = arith.constant 0 : i32
    %c0_i32_1 = arith.constant 0 : i32
    return %c0_i32, %c0_i32_0 : i32, i32
  }
  func.func @transform_2(%arg0: i32) -> (i32, i32) {
    %c0_i32 = arith.constant 0 : i32
    %c0_i32_0 = arith.constant 0 : i32
    %c0_i32_1 = arith.constant 0 : i32
    return %c0_i32, %c0_i32_0 : i32, i32
  }
  func.func @transform_3(%arg0: i32) -> (i32, i32) {
    %c0_i32 = arith.constant 0 : i32
    %c0_i32_0 = arith.constant 0 : i32
    %c0_i32_1 = arith.constant 0 : i32
    return %c0_i32, %c0_i32_0 : i32, i32
  }
  func.func @transform_4(%arg0: i32) -> (i32, i32) {
    %c0_i32 = arith.constant 0 : i32
    %c0_i32_0 = arith.constant 0 : i32
    %c0_i32_1 = arith.constant 0 : i32
    return %c0_i32, %c0_i32_0 : i32, i32
  }
  func.func @transform_5(%arg0: i32) -> (i32, i32) {
    %c0_i32 = arith.constant 0 : i32
    %c0_i32_0 = arith.constant 0 : i32
    %c0_i32_1 = arith.constant 0 : i32
    return %c0_i32, %c0_i32_0 : i32, i32
  }
  func.func @transform_6(%arg0: i32) -> (i32, i32) {
    %c0_i32 = arith.constant 0 : i32
    %c0_i32_0 = arith.constant 0 : i32
    %c0_i32_1 = arith.constant 0 : i32
    return %c0_i32, %c0_i32_0 : i32, i32
  }
  func.func @transform_7(%arg0: i32) -> (i32, i32) {
    %c0_i32 = arith.constant 0 : i32
    %c0_i32_0 = arith.constant 0 : i32
    return %arg0, %c0_i32 : i32, i32
  }
}

</mosaic_0001>

<bundles_post_ra>
// kernel: tpu_custom_call.1
= control target key start
LH: loop header
LB: loop body
LE: loop exit
PB: predicated region body
PF: predicated region fallthrough
CT: control target
= control target key end

     0   :  { %12 = vsyncpa [#allocation3], 0  ;;  %s529_s0 = inlined_call_operand.hbm [shape: bf16[8,32], index: 0, kind: input, shape index: {}]   ;;  %s530_s1 = inlined_call_operand.vmem [shape: bf16[32,64], index: 1, kind: input, shape index: {}]   ;;  %s531_s2 = inlined_call_operand.vmem [shape: f32[1,64], index: 2, kind: input, shape index: {}]   ;;  %s532_s3 = inlined_call_operand.vmem [shape: bf16[64,64], index: 3, kind: input, shape index: {}]   ;;  %s533_s4 = inlined_call_operand.vmem [shape: f32[1,64], index: 4, kind: input, shape index: {}]   ;;  %s534_s5 = inlined_call_operand.vmem [shape: bf16[64,16], index: 5, kind: input, shape index: {}]   ;;  %s535_s6 = inlined_call_operand.vmem [shape: f32[1,16], index: 6, kind: input, shape index: {}]   ;;  %s536_s7 = inlined_call_operand.hbm [shape: f32[8,16], index: 7, kind: output, shape index: {}]  }
   0x1   :  { %13 = vsyncpa [#allocation4], 0  ;;  %s417_s24 = smov [#allocation2]   ;;  %s369_s28 = scalar_lea.hbm %s529_s0, 64 }
   0x2   :  { %s20_s25 = sshll.u32 %s417_s24, 4  ;;  %p370_p0 = scmp.ne.s32.totalorder %s529_s0, %s369_s28  ;;  %s21_s25 = int_to_ptr.vmem [resolvable:$true] %s20_s25 }
   0x3   :  { %p373_p1 = scmp.lt.u32.totalorder %s369_s28, %s529_s0 }
   0x5   :  { %p375_p2 = pnand %p373_p1, %p370_p0 }
   0x7   :  { %378 = shalt.err (!%p375_p2)
}
   0x8   :  { %s379_s10 = scalar_lea.vmem %s21_s25, 64  ;;  %p384_p4 = scmp.lt.s32.totalorder %s21_s25, %s21_s25 }
   0x9   :  { %p380_p3 = scmp.ne.s32.totalorder %s21_s25, %s379_s10  ;;  %p385_p5 = scmp.lt.s32.totalorder %s379_s10, %s379_s10 }
   0xb   :  { %p386_p6 = por %p385_p5, %p384_p4 }
   0xd   :  { %p387_p7 = pnand %p386_p6, %p380_p3 }
   0xf   :  { %390 = shalt.err (!%p387_p7)
}
  0x10   :  { %23 = dma.hbm_to_vmem [thread:$0]  %s529_s0, 64, %s21_s25, [#allocation3]  }
  0x11   :  { %413 = dma.done.wait [#allocation3], 64  }
  0x12   :  { %414 = vsyncadd [#allocation3], 4294967232  ;;  %v418_v0 = vmov 0.0   ;;  %vm419_vm0 = vmmov 0   ;;  %v359_v1 = vld [vmem:[%s530_s1] sm:$0xff]   ;;  %v360_v2 = vld [vmem:[%s530_s1 + $0x8] sm:$0xff]  }
  0x13   :  { %323 = vmatprep.subr.bf16.mxu0 %v418_v0  ;;  %327 = vmatprep.mubr.msk.bf16.mxu0 %vm419_vm0, %v418_v0  ;;  %v361_v3 = vld [vmem:[%s532_s3] sm:$0xff]   ;;  %vm64_vm1 = vcmask 261120   ;;  %v362_v5 = vld [vmem:[%s532_s3 + $0x8] sm:$0xff]   ;;  %v363_v6 = vld [vmem:[%s532_s3 + $0x10] sm:$0xff]   ;;  %vm149_vm2 = vcmask 523264   ;;  %s420_s12 = smov [#allocation5]  }
  0x14   :  { %331 = vmatprep.subr.bf16.mxu1 %v418_v0  ;;  %339 = vmatprep.mubr.msk.bf16.mxu1 %vm419_vm0, %v418_v0  ;;  %v40_v4 = vld [vmem:[#allocation2] sm:$0xf]  ;;  %v364_v7 = vld [vmem:[%s532_s3 + $0x18] sm:$0xff]   ;;  %v366_v9 = vld [vmem:[%s534_s5 + $0x8] sm:$0xff]   ;;  %vm277_vm3 = vcmask 130048  }
  0x15   :  { %324 = vmatpush3.bf16.msra.mxu0 %v359_v1  ;;  %332 = vmatpush3.bf16.msra.mxu1 %v361_v3  ;;  %v365_v8 = vld [vmem:[%s534_s5] sm:$0xff]   ;;  %v367_v18 = vld [vmem:[%s534_s5 + $0x10] sm:$0xff]   ;;  %v368_v19 = vld [vmem:[%s534_s5 + $0x18] sm:$0xff]   ;;  %s285_s5 = sshll.u32 %s420_s12, 4  ;;  %s286_s5 = int_to_ptr.vmem [resolvable:$true] %s285_s5 }
  0x16   :  { %325 = vmatprep.subr.bf16.mxu0 %v418_v0  ;;  %333 = vmatprep.subr.bf16.mxu1 %v418_v0  ;;  %v294_v10 = vld [vmem:[%s531_s2] ss:$0 sm:$0xff]  ;;  %p396_p9 = scmp.lt.s32.totalorder %s286_s5, %s286_s5 }
  0x17   :  { %v298_v20 = vld [vmem:[%s533_s4] ss:$0 sm:$0xff]  ;;  %s391_s4 = scalar_lea.vmem %s286_s5, 128 }
  0x18   :  { %v304_v28 = vld [vmem:[%s535_s6] ss:$0 sm:$0xff]  ;;  %p392_p8 = scmp.ne.s32.totalorder %s286_s5, %s391_s4  ;;  %p397_p10 = scmp.lt.s32.totalorder %s391_s4, %s391_s4 }
  0x19   :  { %326 = vmatpush3.bf16.msra.mxu0 %v360_v2  ;;  %334 = vmatpush3.bf16.msra.mxu1 %v362_v5 }
  0x1a   :  { %343 = vmatprep.subr.bf16.mxu0 %v418_v0  ;;  %335 = vmatprep.subr.bf16.mxu1 %v418_v0  ;;  %p398_p11 = por %p397_p10, %p396_p9 }
  0x1c   :  { %328 = vmatmul.mubr.msk.bf16.vlgmr.msra.gmra.mrb[0].mxu0 %vm64_vm1, %v40_v4  ;;  %p399_p12 = pnand %p398_p11, %p392_p8 }
  0x1d   :  { %351 = vmatprep.mubr.msk.bf16.mxu0 %vm419_vm0, %v418_v0  ;;  %336 = vmatpush3.bf16.msra.mxu1 %v363_v6 }
  0x1e   :  { %337 = vmatprep.subr.bf16.mxu1 %v418_v0  ;;  %344 = vmatpush3.bf16.msra.mxu0 %v365_v8 }
  0x1f   :  { %345 = vmatprep.subr.bf16.mxu0 %v418_v0 }
  0x21   :  { %338 = vmatpush3.bf16.msra.mxu1 %v364_v7 }
  0x22   :  { %346 = vmatpush3.bf16.msra.mxu0 %v366_v9 }
  0x23   :  { %347 = vmatprep.subr.bf16.mxu0 %v418_v0 }
  0x26   :  { %348 = vmatpush3.bf16.msra.mxu0 %v367_v18 }
  0x27   :  { %349 = vmatprep.subr.bf16.mxu0 %v418_v0 }
  0x2a   :  { %350 = vmatpush3.bf16.msra.mxu0 %v368_v19 }
  0xef   :  { %v102_v11 = vpop.f32.mrb[0].mxu0 }
  0xf0   :  { %v103_v12 = vadd.f32 %v294_v10, %v102_v11  ;;  %v329_v13 = vpop.f32.mrb[1].mxu0 }
  0xf1   :  { %v105_v14 = vpop.f32.mrb[2].mxu0 }
  0xf2   :  { %v108_v15 = vmax.f32 %v103_v12, 0.0  ;;  %v330_v16 = vpop.f32.mrb[3].mxu0 }
  0xf4   :  { %v109_v17 = vpack.c.bf16 %v108_v15, %v108_v15 }
  0xf6   :  { %340 = vmatmul.mubr.msk.bf16.vlgmr.msra.gmra.mrb[0].mxu1 %vm149_vm2, %v109_v17 }
 0x1c9   :  { %v187_v21 = vpop.f32.mrb[0].mxu1 }
 0x1ca   :  { %v188_v22 = vadd.f32 %v298_v20, %v187_v21  ;;  %v341_v23 = vpop.f32.mrb[1].mxu1 }
 0x1cb   :  { %v190_v24 = vpop.f32.mrb[2].mxu1 }
 0x1cc   :  { %v193_v25 = vmax.f32 %v188_v22, 0.0  ;;  %v342_v26 = vpop.f32.mrb[3].mxu1 }
 0x1ce   :  { %v194_v27 = vpack.c.bf16 %v193_v25, %v193_v25 }
 0x1d0   :  { %352 = vmatmul.mubr.msk.bf16.vlgmr.msra.gmra.mrb[4].mxu0 %vm149_vm2, %v194_v27 }
 0x2a3   :  { %v271_v29 = vpop.f32.mrb[4].mxu0 }
 0x2a4   :  { %v272_v30 = vadd.f32 %v304_v28, %v271_v29  ;;  %v353_v31 = vpop.f32.mrb[5].mxu0 }
 0x2a5   :  { %v274_v32 = vpop.f32.mrb[6].mxu0 }
 0x2a6   :  { %v354_v33 = vpop.f32.mrb[7].mxu0  ;;  %278 = vst.msk [vmem:[#allocation5] sm:$0xff] %vm277_vm3, %v272_v30 }
 0x2a7   :  { %402 = shalt.err (!%p399_p12)
}
 0x2a8   :  { %s403_s6 = scalar_lea.hbm %s536_s7, 128 }
 0x2a9   :  { %p404_p13 = scmp.ne.s32.totalorder %s536_s7, %s403_s6  ;;  %p407_p0 = scmp.lt.u32.totalorder %s403_s6, %s536_s7 }
 0x2ab   :  { %p409_p1 = pnand %p407_p0, %p404_p13 }
 0x2ad   :  { %412 = shalt.err (!%p409_p1)
}
 0x2ae   :  { %288 = dma.vmem_to_hbm [thread:$0]  %s286_s5, 128, %s536_s7, [#allocation4]  }
 0x2af   :  { %415 = dma.done.wait [#allocation4], 128  }
 0x2b0   :  { %416 = vsyncadd [#allocation4], 4294967168 }
 0x2b1   :  { %292 = vsyncpa [#allocation3], 1 }
 0x2b2   :  { %293 = vsyncpa [#allocation4], 1 }

</bundles_post_ra>
